<compile_context>
chip_gen: v6e
topology: v6e:2x2x1
jax: 0.10.0
libtpu: 0.0.40
codegen_flags: <defaults>
</compile_context>

<pallas_src>
import functools

import jax
import jax.numpy as jnp
from jax.experimental import pallas as pl
from jax.experimental.pallas import tpu as pltpu

LANE = 128      # vreg lane width  (last dim alignment)
SUBLANE = 8     # vreg sublane width (second-to-last dim alignment)


def _round_up(n, m):
    return ((n + m - 1) // m) * m


def _fused_mlp_kernel(*refs, n_layers, out_widths):
    """refs = (x_ref, w0, w1, ..., w{L-1}, bias_stack, o_ref).

    One batch tile flows through all layers inside a single kernel body:
    bf16 MXU matmuls (f32 accumulation), f32 VPU bias adds, f32 EUP tanh.
    Intermediates never leave vregs/VMEM.
    """
    x_ref = refs[0]
    w_refs = refs[1:1 + n_layers]
    b_ref = refs[1 + n_layers]          # (n_layers, Dmax_pad) f32 bias stack
    o_ref = refs[-1]

    h = x_ref[...]                      # bf16 activations into the MXU
    for i in range(n_layers):
        acc = jnp.dot(h, w_refs[i][...], preferred_element_type=jnp.float32)
        acc = acc + b_ref[i:i + 1, :out_widths[i]]   # static, 128-aligned slice
        if i + 1 < n_layers:            # Tanh on all but the last layer
            h = jnp.tanh(acc).astype(jnp.bfloat16)
        else:
            h = acc
    o_ref[...] = h.astype(o_ref.dtype)


def pad_mlp_params(params, input_dim):
    """One-time padding/packing of parameters (do NOT call per forward).

    Weights -> bf16, zero-padded to (in_pad, out_pad) multiples of 128.
    Biases  -> one f32 stack (n_layers, Dmax_pad), zero-padded.
    """
    dims = [input_dim] + [w.shape[1] for (w, _) in params]
    dims_pad = [_round_up(d, LANE) for d in dims]
    n_layers = len(params)
    d_max = max(dims_pad[1:])

    w_padded = []
    for i, (w, _) in enumerate(params):
        wp = jnp.zeros((dims_pad[i], dims_pad[i + 1]), jnp.bfloat16)
        wp = wp.at[: dims[i], : dims[i + 1]].set(w.astype(jnp.bfloat16))
        w_padded.append(wp)

    b_stack = jnp.zeros((n_layers, d_max), jnp.float32)
    for i, (_, b) in enumerate(params):
        b_stack = b_stack.at[i, : dims[i + 1]].set(b.astype(jnp.float32))

    return {
        "weights": tuple(w_padded),
        "bias_stack": b_stack,
        "dims": tuple(dims),
        "dims_pad": tuple(dims_pad),
    }


def mlp_forward_padded(x, padded, *, block_batch=256):
    """Full MLP forward (one pallas_call) using pre-padded parameters."""
    weights = padded["weights"]
    b_stack = padded["bias_stack"]
    dims = padded["dims"]
    dims_pad = padded["dims_pad"]
    n_layers = len(weights)

    B, Din = x.shape
    assert Din == dims[0], "input feature dim mismatch"

    # Batch tile: default 256 (fills 256-wide v6e/v7x MXU, amortizes step
    # overhead).  Tune per generation; for large B keep >= 2 grid steps so
    # v7x megacore can split the "parallel" batch axis.
    tm = min(block_batch, _round_up(B, SUBLANE))
    B_pad = _round_up(_round_up(B, SUBLANE), tm)

    # Only the activation tile is padded per call (bf16 halves input DMA).
    x_p = jnp.zeros((B_pad, dims_pad[0]), jnp.bfloat16)
    x_p = x_p.at[:B, :Din].set(x.astype(jnp.bfloat16))

    grid = (B_pad // tm,)

    # Batch-tiled activations; weights/bias resident, single-buffered (same
    # block every step -> double-buffering would only waste VMEM).
    in_specs = [pl.BlockSpec((tm, dims_pad[0]), lambda i: (i, 0))]
    for li in range(n_layers):
        in_specs.append(
            pl.BlockSpec((dims_pad[li], dims_pad[li + 1]), lambda i: (0, 0),
                         pipeline_mode=pl.Buffered(1)))
    in_specs.append(
        pl.BlockSpec(b_stack.shape, lambda i: (0, 0),
                     pipeline_mode=pl.Buffered(1)))
    out_specs = pl.BlockSpec((tm, dims_pad[-1]), lambda i: (i, 0))

    # Explicit VMEM budget (resident weights + double-buffered act tiles +
    # f32 intermediates), clamped to the v7x 64 MiB physical ceiling.
    bytes_x_tile = tm * dims_pad[0] * 2 * 2                 # bf16, 2 buffers
    bytes_o_tile = tm * dims_pad[-1] * 4 * 2                # f32,  2 buffers
    bytes_w = sum(dims_pad[i] * dims_pad[i + 1] * 2 for i in range(n_layers))
    bytes_b = b_stack.size * 4
    bytes_h = tm * max(dims_pad) * 4 * 4                    # f32 intermediates
    footprint = bytes_x_tile + bytes_o_tile + bytes_w + bytes_b + bytes_h
    vmem_limit = int(min(64 * 2**20, max(32 * 2**20, 2 * footprint)))

    # Advisory cost hint so XLA schedules the custom call sensibly.
    flops = sum(2 * B_pad * dims_pad[i] * dims_pad[i + 1]
                for i in range(n_layers))
    transcendentals = sum(B_pad * dims_pad[i + 1]
                          for i in range(n_layers - 1))
    bytes_accessed = (x_p.size * 2 + bytes_w + bytes_b
                      + B_pad * dims_pad[-1] * 4)

    out_pad = pl.pallas_call(
        functools.partial(_fused_mlp_kernel,
                          n_layers=n_layers,
                          out_widths=tuple(dims_pad[1:])),
        out_shape=jax.ShapeDtypeStruct((B_pad, dims_pad[-1]), jnp.float32),
        grid_spec=pltpu.PrefetchScalarGridSpec(
            num_scalar_prefetch=0,
            grid=grid,
            in_specs=in_specs,
            out_specs=out_specs,
        ),
        compiler_params=pltpu.CompilerParams(
            dimension_semantics=("parallel",),   # batch tiles independent
            vmem_limit_bytes=vmem_limit,
        ),
        cost_estimate=pl.CostEstimate(
            flops=flops,
            transcendentals=transcendentals,
            bytes_accessed=bytes_accessed,
        ),
    )(x_p, *weights, b_stack)

    return out_pad[:B, : dims[-1]]


def mlp_forward(x, params, *, block_batch=256):
    """Convenience wrapper (pads params every call — prefer pad_mlp_params +
    mlp_forward_padded for repeated forwards)."""
    padded = pad_mlp_params(params, x.shape[1])
    return mlp_forward_padded(x, padded, block_batch=block_batch)


def init_mlp_params(key, input_dim, hidden_dims, out_dim, dtype=jnp.float32):
    """Xavier-normal weights (stored as [in, out]) + uniform biases, matching
    the PyTorch module's layer shapes."""
    dims = [input_dim] + list(hidden_dims) + [out_dim]
    params = []
    for i in range(len(dims) - 1):
        key, wk, bk = jax.random.split(key, 3)
        fan_in, fan_out = dims[i], dims[i + 1]
        std = (2.0 / (fan_in + fan_out)) ** 0.5          # xavier_normal gain=1
        w = std * jax.random.normal(wk, (fan_in, fan_out), dtype=dtype)
        bound = 1.0 / (fan_in ** 0.5)
        b = jax.random.uniform(bk, (fan_out,), dtype=dtype,
                               minval=-bound, maxval=bound)
        params.append((w, b))
    return params


if __name__ == "__main__":
    key = jax.random.PRNGKey(0)
    key, xk = jax.random.split(key)

    batch = 8
    input_dim = 32
    hidden_dims = [64, 64]
    out_dim = 16

    x = jax.random.normal(xk, (batch, input_dim), dtype=jnp.float32)
    params = init_mlp_params(key, input_dim, hidden_dims, out_dim)

    # Pad/pack parameters once, then run the fused forward.
    padded = pad_mlp_params(params, input_dim)
    out = mlp_forward_padded(x, padded)
    out = jax.block_until_ready(out)

    # Pure-JAX f32 reference of the same math (Linear -> Tanh ... -> Linear).
    ref = x
    for i, (w, b) in enumerate(params):
        ref = ref @ w + b
        if i + 1 < len(params):
            ref = jnp.tanh(ref)

    assert out.shape == (batch, out_dim)
    # bf16 MXU operands (f32 accumulation) -> looser tolerance vs f32 ref.
    assert jnp.allclose(out, ref, atol=3e-2, rtol=3e-2), (
        float(jnp.max(jnp.abs(out - ref))))

    print("KERNEL_OK")
</pallas_src>

<mosaic_0001>
module attributes {stable_mosaic.version = 11 : i64} {
  func.func @_fused_mlp_kernel(%arg0: i32, %arg1: memref<8x128xbf16, #tpu.memory_space<vmem>>, %arg2: memref<128x128xbf16, #tpu.memory_space<vmem>>, %arg3: memref<128x128xbf16, #tpu.memory_space<vmem>>, %arg4: memref<128x128xbf16, #tpu.memory_space<vmem>>, %arg5: memref<3x128xf32, #tpu.memory_space<vmem>>, %arg6: memref<8x128xf32, #tpu.memory_space<vmem>>) attributes {dimension_semantics = [#tpu.dimension_semantics<parallel>], iteration_bounds = array<i64: 1>, scalar_prefetch = 0 : i64, scratch_operands = 0 : i64, tpu.core_type = #tpu.core_type<tc>, window_params = [{transform_indices = @transform_0, window_bounds = array<i64: 8, 128>}, {pipeline_mode = #tpu.pipeline_mode<synchronous>, transform_indices = @transform_1, window_bounds = array<i64: 128, 128>}, {pipeline_mode = #tpu.pipeline_mode<synchronous>, transform_indices = @transform_2, window_bounds = array<i64: 128, 128>}, {pipeline_mode = #tpu.pipeline_mode<synchronous>, transform_indices = @transform_3, window_bounds = array<i64: 128, 128>}, {pipeline_mode = #tpu.pipeline_mode<synchronous>, transform_indices = @transform_4, window_bounds = array<i64: 3, 128>}, {transform_indices = @transform_5, window_bounds = array<i64: 8, 128>}]} {
    %c0 = arith.constant 0 : index
    %c0_0 = arith.constant 0 : index
    %0 = vector.load %arg1[%c0, %c0_0] : memref<8x128xbf16, #tpu.memory_space<vmem>>, vector<8x128xbf16>
    %c0_1 = arith.constant 0 : index
    %c0_2 = arith.constant 0 : index
    %1 = vector.load %arg2[%c0_1, %c0_2] : memref<128x128xbf16, #tpu.memory_space<vmem>>, vector<128x128xbf16>
    %cst = arith.constant dense<0.000000e+00> : vector<8x128xf32>
    %2 = tpu.matmul %0, %1, %cst {dimension_numbers = #tpu.dot_dimension_numbers<[1], [0], [0], [1], [0, 0, 1, 1], [], []>} : vector<8x128xbf16>, vector<128x128xbf16>, vector<8x128xf32> -> vector<8x128xf32>
    %c0_3 = arith.constant 0 : index
    %c0_4 = arith.constant 0 : index
    %3 = vector.load %arg5[%c0_3, %c0_4] : memref<3x128xf32, #tpu.memory_space<vmem>>, vector<1x128xf32>
    %4 = vector.broadcast %3 : vector<1x128xf32> to vector<8x128xf32>
    %5 = arith.addf %2, %4 : vector<8x128xf32>
    %6 = math.tanh %5 : vector<8x128xf32>
    %7 = arith.truncf %6 : vector<8x128xf32> to vector<8x128xbf16>
    %c0_5 = arith.constant 0 : index
    %c0_6 = arith.constant 0 : index
    %8 = vector.load %arg3[%c0_5, %c0_6] : memref<128x128xbf16, #tpu.memory_space<vmem>>, vector<128x128xbf16>
    %cst_7 = arith.constant dense<0.000000e+00> : vector<8x128xf32>
    %9 = tpu.matmul %7, %8, %cst_7 {dimension_numbers = #tpu.dot_dimension_numbers<[1], [0], [0], [1], [0, 0, 1, 1], [], []>} : vector<8x128xbf16>, vector<128x128xbf16>, vector<8x128xf32> -> vector<8x128xf32>
    %c1 = arith.constant 1 : index
    %c0_8 = arith.constant 0 : index
    %10 = vector.load %arg5[%c1, %c0_8] : memref<3x128xf32, #tpu.memory_space<vmem>>, vector<1x128xf32>
    %11 = vector.broadcast %10 : vector<1x128xf32> to vector<8x128xf32>
    %12 = arith.addf %9, %11 : vector<8x128xf32>
    %13 = math.tanh %12 : vector<8x128xf32>
    %14 = arith.truncf %13 : vector<8x128xf32> to vector<8x128xbf16>
    %c0_9 = arith.constant 0 : index
    %c0_10 = arith.constant 0 : index
    %15 = vector.load %arg4[%c0_9, %c0_10] : memref<128x128xbf16, #tpu.memory_space<vmem>>, vector<128x128xbf16>
    %cst_11 = arith.constant dense<0.000000e+00> : vector<8x128xf32>
    %16 = tpu.matmul %14, %15, %cst_11 {dimension_numbers = #tpu.dot_dimension_numbers<[1], [0], [0], [1], [0, 0, 1, 1], [], []>} : vector<8x128xbf16>, vector<128x128xbf16>, vector<8x128xf32> -> vector<8x128xf32>
    %c2 = arith.constant 2 : index
    %c0_12 = arith.constant 0 : index
    %17 = vector.load %arg5[%c2, %c0_12] : memref<3x128xf32, #tpu.memory_space<vmem>>, vector<1x128xf32>
    %18 = vector.broadcast %17 : vector<1x128xf32> to vector<8x128xf32>
    %19 = arith.addf %16, %18 : vector<8x128xf32>
    %c0_13 = arith.constant 0 : index
    %c0_14 = arith.constant 0 : index
    %20 = vector.load %arg6[%c0_13, %c0_14] : memref<8x128xf32, #tpu.memory_space<vmem>>, vector<8x128xf32>
    tpu.vector_store %arg6[%c0_13, %c0_14], %19 {strides = array<i32>} : memref<8x128xf32, #tpu.memory_space<vmem>>, vector<8x128xf32>,
    return
  }
  func.func @transform_0(%arg0: i32) -> (i32, i32) {
    %c0_i32 = arith.constant 0 : i32
    %c0_i32_0 = arith.constant 0 : i32
    return %arg0, %c0_i32 : i32, i32
  }
  func.func @transform_1(%arg0: i32) -> (i32, i32) {
    %c0_i32 = arith.constant 0 : i32
    %c0_i32_0 = arith.constant 0 : i32
    %c0_i32_1 = arith.constant 0 : i32
    return %c0_i32, %c0_i32_0 : i32, i32
  }
  func.func @transform_2(%arg0: i32) -> (i32, i32) {
    %c0_i32 = arith.constant 0 : i32
    %c0_i32_0 = arith.constant 0 : i32
    %c0_i32_1 = arith.constant 0 : i32
    return %c0_i32, %c0_i32_0 : i32, i32
  }
  func.func @transform_3(%arg0: i32) -> (i32, i32) {
    %c0_i32 = arith.constant 0 : i32
    %c0_i32_0 = arith.constant 0 : i32
    %c0_i32_1 = arith.constant 0 : i32
    return %c0_i32, %c0_i32_0 : i32, i32
  }
  func.func @transform_4(%arg0: i32) -> (i32, i32) {
    %c0_i32 = arith.constant 0 : i32
    %c0_i32_0 = arith.constant 0 : i32
    %c0_i32_1 = arith.constant 0 : i32
    return %c0_i32, %c0_i32_0 : i32, i32
  }
  func.func @transform_5(%arg0: i32) -> (i32, i32) {
    %c0_i32 = arith.constant 0 : i32
    %c0_i32_0 = arith.constant 0 : i32
    return %arg0, %c0_i32 : i32, i32
  }
}

</mosaic_0001>

<bundles_post_ra>
// kernel: tpu_custom_call.1
= control target key start
LH: loop header
LB: loop body
LE: loop exit
PB: predicated region body
PF: predicated region fallthrough
CT: control target
= control target key end

     0   :  { %10 = vsyncpa [#allocation3], 0  ;;  %s786_s0 = inlined_call_operand.hbm [shape: bf16[8,128], index: 0, kind: input, shape index: {}]   ;;  %s787_s1 = inlined_call_operand.hbm [shape: bf16[128,128], index: 1, kind: input, shape index: {}]   ;;  %s788_s2 = inlined_call_operand.hbm [shape: bf16[128,128], index: 2, kind: input, shape index: {}]   ;;  %s789_s3 = inlined_call_operand.hbm [shape: bf16[128,128], index: 3, kind: input, shape index: {}]   ;;  %s790_s4 = inlined_call_operand.vmem [shape: f32[3,128], index: 4, kind: input, shape index: {}]   ;;  %s791_s5 = inlined_call_operand.hbm [shape: f32[8,128], index: 5, kind: output, shape index: {}]  }
   0x1   :  { %11 = vsyncpa [#allocation6], 0 }
   0x2   :  { %12 = vsyncpa [#allocation9], 0 }
   0x3   :  { %13 = vsyncpa [#allocation4], 0  ;;  %s684_s18 = smov [#allocation5]  }
   0x4   :  { %s29_s19 = sshll.u32 %s684_s18, 4  ;;  %s30_s19 = int_to_ptr.vmem [resolvable:$true] %s29_s19 }
   0x5   :  { %s584_s20 = scalar_lea.vmem %s30_s19, 1024  ;;  %p589_p1 = scmp.lt.s32.totalorder %s30_s19, %s30_s19 }
   0x6   :  { %p585_p0 = scmp.ne.s32.totalorder %s30_s19, %s584_s20  ;;  %p590_p2 = scmp.lt.s32.totalorder %s584_s20, %s584_s20 }
   0x8   :  { %p591_p3 = por %p590_p2, %p589_p1 }
   0xa   :  { %p592_p4 = pnand %p591_p3, %p585_p0 }
   0xc   :  { %595 = shalt.err (!%p592_p4)
}
   0xd   :  { %s685_s21 = smov 64   ;;  %s686_s22 = smov 4  }
   0xe   :  { %35 = dma.hbm_to_vmem [thread:$0]  %s787_s1, 1024, %s30_s19, [#allocation6], %s685_s21, %s685_s21, %s686_s22  }
   0xf   :  { %s687_s25 = smov [#allocation2]   ;;  %s688_s27 = smov [#allocation7]  }
  0x10   :  { %s20_s26 = sshll.u32 %s687_s25, 4  ;;  %s41_s28 = sshll.u32 %s688_s27, 4  ;;  %s21_s26 = int_to_ptr.vmem [resolvable:$true] %s20_s26  ;;  %s42_s28 = int_to_ptr.vmem [resolvable:$true] %s41_s28 }
  0x11   :  { %s604_s29 = scalar_lea.vmem %s21_s26, 64  ;;  %p609_p6 = scmp.lt.s32.totalorder %s21_s26, %s21_s26 }
  0x12   :  { %p605_p5 = scmp.ne.s32.totalorder %s21_s26, %s604_s29  ;;  %p610_p7 = scmp.lt.s32.totalorder %s604_s29, %s604_s29 }
  0x14   :  { %p611_p8 = por %p610_p7, %p609_p6 }
  0x16   :  { %p612_p9 = pnand %p611_p8, %p605_p5 }
  0x18   :  { %615 = shalt.err (!%p612_p9)
}
  0x19   :  { %23 = dma.hbm_to_vmem [thread:$0]  %s786_s0, 64, %s21_s26, [#allocation3]  }
  0x1a   :  { %s624_s7 = scalar_lea.vmem %s42_s28, 1024  ;;  %p629_p11 = scmp.lt.s32.totalorder %s42_s28, %s42_s28 }
  0x1b   :  { %p625_p10 = scmp.ne.s32.totalorder %s42_s28, %s624_s7  ;;  %p630_p12 = scmp.lt.s32.totalorder %s624_s7, %s624_s7 }
  0x1d   :  { %p631_p13 = por %p630_p12, %p629_p11 }
  0x1f   :  { %p632_p0 = pnand %p631_p13, %p625_p10 }
  0x21   :  { %635 = shalt.err (!%p632_p0)
}
  0x22   :  { %47 = dma.hbm_to_vmem [thread:$0]  %s788_s2, 1024, %s42_s28, [#allocation6], %s685_s21, %s685_s21, %s686_s22  }
  0x23   :  { %s689_s9 = smov [#allocation8]  }
  0x24   :  { %s53_s10 = sshll.u32 %s689_s9, 4  ;;  %s54_s10 = int_to_ptr.vmem [resolvable:$true] %s53_s10 }
  0x25   :  { %s644_s11 = scalar_lea.vmem %s54_s10, 1024  ;;  %p649_p2 = scmp.lt.s32.totalorder %s54_s10, %s54_s10 }
  0x26   :  { %p645_p1 = scmp.ne.s32.totalorder %s54_s10, %s644_s11  ;;  %p650_p3 = scmp.lt.s32.totalorder %s644_s11, %s644_s11 }
  0x28   :  { %p651_p4 = por %p650_p3, %p649_p2 }
  0x2a   :  { %p652_p5 = pnand %p651_p4, %p645_p1 }
  0x2c   :  { %655 = shalt.err (!%p652_p5)
}
  0x2d   :  { %59 = dma.hbm_to_vmem [thread:$0]  %s789_s3, 1024, %s54_s10, [#allocation9], %s685_s21, %s685_s21, %s686_s22  }
  0x2e   :  { %676 = dma.done.wait [#allocation3], 64  }
  0x2f   :  { %677 = vsyncadd [#allocation3], 4294967232 }
  0x30   :  { %678 = dma.done.wait [#allocation6], 2048  }
  0x31   :  { %679 = vsyncadd [#allocation6], 4294965248 }
  0x32   :  { %680 = dma.done.wait [#allocation9], 1024  }
  0x33   :  { %681 = vsyncadd [#allocation9], 4294966272  ;;  %v690_v0 = vmov 0.0   ;;  %vm691_vm0 = vmmov 0   ;;  %v548_v1 = vld [vmem:[#allocation5 + $0x38] sm:$0xff]   ;;  %v549_v2 = vld [vmem:[#allocation5 + $0x30] sm:$0xff]  }
  0x34   :  { %479 = vmatprep.subr.bf16.mxu0 %v690_v0  ;;  %495 = vmatprep.mubr.msk.bf16.mxu0 %vm691_vm0, %v690_v0  ;;  %v550_v3 = vld [vmem:[#allocation5 + $0x28] sm:$0xff]   ;;  %v556_v4 = vld [vmem:[#allocation7 + $0x38] sm:$0xff]   ;;  %v551_v5 = vld [vmem:[#allocation5 + $0x20] sm:$0xff]   ;;  %s692_s17 = smov [#allocation10]  }
  0x35   :  { %499 = vmatprep.subr.bf16.mxu1 %v690_v0  ;;  %515 = vmatprep.mubr.msk.bf16.mxu1 %vm691_vm0, %v690_v0  ;;  %v557_v6 = vld [vmem:[#allocation7 + $0x30] sm:$0xff]   ;;  %v552_v7 = vld [vmem:[#allocation5 + $0x18] sm:$0xff]   ;;  %v558_v8 = vld [vmem:[#allocation7 + $0x28] sm:$0xff]   ;;  %s414_s18 = sshll.u32 %s692_s17, 4  ;;  %s415_s18 = int_to_ptr.vmem [resolvable:$true] %s414_s18 }
  0x36   :  { %480 = vmatpush3.bf16.msra.mxu0 %v548_v1  ;;  %500 = vmatpush3.bf16.msra.mxu1 %v556_v4  ;;  %v553_v9 = vld [vmem:[#allocation5 + $0x10] sm:$0xff]   ;;  %v554_v10 = vld [vmem:[#allocation5 + $0x8] sm:$0xff]   ;;  %v555_v11 = vld [vmem:[#allocation5] sm:$0xff]   ;;  %s656_s19 = scalar_lea.vmem %s415_s18, 128  ;;  %p661_p7 = scmp.lt.s32.totalorder %s415_s18, %s415_s18 }
  0x37   :  { %481 = vmatprep.subr.bf16.mxu0 %v690_v0  ;;  %501 = vmatprep.subr.bf16.mxu1 %v690_v0  ;;  %v75_v12 = vld [vmem:[#allocation2] sm:$0xf]  ;;  %v559_v13 = vld [vmem:[#allocation7 + $0x20] sm:$0xff]   ;;  %v561_v15 = vld [vmem:[#allocation7 + $0x10] sm:$0xff]   ;;  %p657_p6 = scmp.ne.s32.totalorder %s415_s18, %s656_s19  ;;  %p662_p8 = scmp.lt.s32.totalorder %s656_s19, %s656_s19 }
  0x38   :  { %v560_v14 = vld [vmem:[#allocation7 + $0x18] sm:$0xff]   ;;  %v562_v16 = vld [vmem:[#allocation7 + $0x8] sm:$0xff]   ;;  %v563_v17 = vld [vmem:[#allocation7] sm:$0xff]  }
  0x39   :  { %v564_v18 = vld [vmem:[#allocation8 + $0x38] sm:$0xff]   ;;  %v565_v19 = vld [vmem:[#allocation8 + $0x30] sm:$0xff]   ;;  %v566_v20 = vld [vmem:[#allocation8 + $0x28] sm:$0xff]   ;;  %p663_p9 = por %p662_p8, %p661_p7 }
  0x3a   :  { %482 = vmatpush3.bf16.msra.mxu0 %v549_v2  ;;  %502 = vmatpush3.bf16.msra.mxu1 %v557_v6  ;;  %v425_v21 = vld [vmem:[%s790_s4] ss:$0 sm:$0xff]  ;;  %v567_v29 = vld [vmem:[#allocation8 + $0x20] sm:$0xff]   ;;  %v569_v31 = vld [vmem:[#allocation8 + $0x10] sm:$0xff]  }
  0x3b   :  { %483 = vmatprep.subr.bf16.mxu0 %v690_v0  ;;  %503 = vmatprep.subr.bf16.mxu1 %v690_v0  ;;  %v568_v30 = vld [vmem:[#allocation8 + $0x18] sm:$0xff]   ;;  %v570_v32 = vld [vmem:[#allocation8 + $0x8] sm:$0xff]   ;;  %v571_v33 = vld [vmem:[#allocation8] sm:$0xff]   ;;  %p664_p10 = pnand %p663_p9, %p657_p6 }
  0x3c   :  { %v434_v34 = vld [vmem:[%s790_s4 + $0x1] ss:$0 sm:$0xff]  ;;  %v443_v42 = vld [vmem:[%s790_s4 + $0x2] ss:$0 sm:$0xff] }
  0x3e   :  { %484 = vmatpush3.bf16.msra.mxu0 %v550_v3  ;;  %504 = vmatpush3.bf16.msra.mxu1 %v558_v8 }
  0x3f   :  { %485 = vmatprep.subr.bf16.mxu0 %v690_v0  ;;  %505 = vmatprep.subr.bf16.mxu1 %v690_v0 }
  0x42   :  { %486 = vmatpush3.bf16.msra.mxu0 %v551_v5  ;;  %506 = vmatpush3.bf16.msra.mxu1 %v559_v13 }
  0x43   :  { %487 = vmatprep.subr.bf16.mxu0 %v690_v0  ;;  %507 = vmatprep.subr.bf16.mxu1 %v690_v0 }
  0x46   :  { %488 = vmatpush3.bf16.msra.mxu0 %v552_v7  ;;  %508 = vmatpush3.bf16.msra.mxu1 %v560_v14 }
  0x47   :  { %489 = vmatprep.subr.bf16.mxu0 %v690_v0  ;;  %509 = vmatprep.subr.bf16.mxu1 %v690_v0 }
  0x4a   :  { %490 = vmatpush3.bf16.msra.mxu0 %v553_v9  ;;  %510 = vmatpush3.bf16.msra.mxu1 %v561_v15 }
  0x4b   :  { %491 = vmatprep.subr.bf16.mxu0 %v690_v0  ;;  %511 = vmatprep.subr.bf16.mxu1 %v690_v0 }
  0x4e   :  { %492 = vmatpush3.bf16.msra.mxu0 %v554_v10  ;;  %512 = vmatpush3.bf16.msra.mxu1 %v562_v16 }
  0x4f   :  { %493 = vmatprep.subr.bf16.mxu0 %v690_v0  ;;  %513 = vmatprep.subr.bf16.mxu1 %v690_v0 }
  0x52   :  { %494 = vmatpush3.bf16.msra.mxu0 %v555_v11  ;;  %514 = vmatpush3.bf16.msra.mxu1 %v563_v17 }
  0x53   :  { %519 = vmatprep.subr.bf16.mxu0 %v690_v0 }
  0x55   :  { %496 = vmatmul.mubr.bf16.vlgmr.msra.gmra.mxu0 %v75_v12 }
  0x56   :  { %535 = vmatprep.mubr.msk.bf16.mxu0 %vm691_vm0, %v690_v0  ;;  %520 = vmatpush3.bf16.msra.mxu0 %v564_v18 }
  0x57   :  { %521 = vmatprep.subr.bf16.mxu0 %v690_v0 }
  0x5a   :  { %522 = vmatpush3.bf16.msra.mxu0 %v565_v19 }
  0x5b   :  { %523 = vmatprep.subr.bf16.mxu0 %v690_v0 }
  0x5e   :  { %524 = vmatpush3.bf16.msra.mxu0 %v566_v20 }
  0x5f   :  { %525 = vmatprep.subr.bf16.mxu0 %v690_v0 }
  0x62   :  { %526 = vmatpush3.bf16.msra.mxu0 %v567_v29 }
  0x63   :  { %527 = vmatprep.subr.bf16.mxu0 %v690_v0 }
  0x66   :  { %528 = vmatpush3.bf16.msra.mxu0 %v568_v30 }
  0x67   :  { %529 = vmatprep.subr.bf16.mxu0 %v690_v0 }
  0x6a   :  { %530 = vmatpush3.bf16.msra.mxu0 %v569_v31 }
  0x6b   :  { %531 = vmatprep.subr.bf16.mxu0 %v690_v0 }
  0x6e   :  { %532 = vmatpush3.bf16.msra.mxu0 %v570_v32 }
  0x6f   :  { %533 = vmatprep.subr.bf16.mxu0 %v690_v0 }
  0x72   :  { %534 = vmatpush3.bf16.msra.mxu0 %v571_v33 }
 0x115   :  { %v179_v22 = vpop.f32.mrf.mxu0 }
 0x116   :  { %v180_v23 = vadd.f32 %v425_v21, %v179_v22 }
 0x117   :  { %v497_v24 = vpop.f32.mrf.mxu0 }
 0x118   :  { %572 = vtanh.f32 %v180_v23 }
 0x119   :  { %v182_v25 = vpop.f32.mrf.mxu0 }
 0x11b   :  { %v498_v26 = vpop.f32.mrf.mxu0 }
 0x125   :  { %v573_v27 = vpop.eup %572 }
 0x126   :  { %v186_v28 = vpack.c.bf16 %v573_v27, %v573_v27 }
 0x128   :  { %516 = vmatmul.mubr.bf16.vlgmr.msra.gmra.mxu1 %v186_v28 }
 0x1e8   :  { %v290_v35 = vpop.f32.mrf.mxu1 }
 0x1e9   :  { %v291_v36 = vadd.f32 %v434_v34, %v290_v35 }
 0x1ea   :  { %v517_v37 = vpop.f32.mrf.mxu1 }
 0x1eb   :  { %574 = vtanh.f32 %v291_v36 }
 0x1ec   :  { %v293_v38 = vpop.f32.mrf.mxu1 }
 0x1ee   :  { %v518_v39 = vpop.f32.mrf.mxu1 }
 0x1f8   :  { %v575_v40 = vpop.eup %574 }
 0x1f9   :  { %v297_v41 = vpack.c.bf16 %v575_v40, %v575_v40 }
 0x1fb   :  { %536 = vmatmul.mubr.bf16.vlgmr.msra.gmra.mxu0 %v297_v41 }
 0x2bb   :  { %v401_v43 = vpop.f32.mrf.mxu0 }
 0x2bc   :  { %v402_v44 = vadd.f32 %v443_v42, %v401_v43 }
 0x2bd   :  { %v537_v45 = vpop.f32.mrf.mxu0 }
 0x2be   :  { %407 = vst [vmem:[#allocation10] sm:$0xff] %v402_v44 }
 0x2bf   :  { %v404_v46 = vpop.f32.mrf.mxu0 }
 0x2c0   :  { %667 = shalt.err (!%p664_p10)
}
 0x2c1   :  { %417 = dma.vmem_to_hbm [thread:$0]  %s415_s18, 128, %s791_s5, [#allocation4]   ;;  %v538_v47 = vpop.f32.mrf.mxu0 }
 0x2c2   :  { %682 = dma.done.wait [#allocation4], 128  }
 0x2c3   :  { %683 = vsyncadd [#allocation4], 4294967168 }
 0x2c4   :  { %421 = vsyncpa [#allocation3], 1 }
 0x2c5   :  { %422 = vsyncpa [#allocation6], 1 }
 0x2c6   :  { %423 = vsyncpa [#allocation9], 1 }
 0x2c7   :  { %424 = vsyncpa [#allocation4], 1 }

</bundles_post_ra>
